<compile_context>
chip_gen: v7x
topology: tpu7x:2x2x1
jax: 0.10.0
libtpu: 0.0.40
codegen_flags: <defaults>
</compile_context>

<pallas_src>
import functools

import jax
import jax.numpy as jnp
from jax import lax
from jax.experimental import pallas as pl
from jax.experimental.pallas import tpu as pltpu


LANE = 128     # TPU lane width; action dim is padded to a multiple of this.
SUBLANE = 16   # bf16 sublane packing; batch tiles are multiples of 16.


def _round_up(x, m):
    return ((x + m - 1) // m) * m


def _gumbel_noise(row, col, n_cols, seed_u32):
    """Counter-based Gumbel(0,1) noise from a murmur3-style integer hash.

    Pure jnp integer/float ops -> lowers on Mosaic TPU (VPU + EUP) and in
    interpret mode.  The counter is the GLOBAL (row * n_cols + col) index, so
    a given row always sees the same stream regardless of batch tiling.
    """
    ctr = (row * n_cols + col).astype(jnp.uint32)
    x = ctr + seed_u32 * jnp.uint32(0x9E3779B1)          # mix the seed in
    x = x ^ (x >> jnp.uint32(16))                        # murmur3 fmix32:
    x = x * jnp.uint32(0x85EBCA6B)                       #   full avalanche,
    x = x ^ (x >> jnp.uint32(13))                        #   decorrelates
    x = x * jnp.uint32(0xC2B2AE35)                       #   consecutive ctrs
    x = x ^ (x >> jnp.uint32(16))
    # 24 high bits -> uniform in (0, 1); OR the low bit so u > 0 (no clamp).
    u24 = (x >> jnp.uint32(8)) | jnp.uint32(1)
    u = u24.astype(jnp.int32).astype(jnp.float32) * jnp.float32(1.0 / (1 << 24))
    return -jnp.log(-jnp.log(u))                         # EUP transcendentals


def _policy_kernel(action_size, seed_ref, x_ref, w1_ref, b1_ref, w2_ref,
                   b2_ref, act_ref, logits_ref=None):
    tb = act_ref.shape[0]
    ap = w2_ref.shape[1]

    # ---- MLP: Linear -> ReLU -> Linear (bf16 MXU matmuls, f32 accumulate) ----
    h = jnp.dot(x_ref[...], w1_ref[...], preferred_element_type=jnp.float32)
    h = jnp.maximum(h + b1_ref[...], 0.0)                       # ReLU on VPU
    z = jnp.dot(h.astype(w2_ref.dtype), w2_ref[...],
                preferred_element_type=jnp.float32)
    z = z + b2_ref[...]                                         # (TB, AP) f32

    if logits_ref is not None:          # optional output (off on the hot path)
        logits_ref[...] = z             # lane-dense unmasked vector stores

    # ---- Categorical sample via Gumbel-max, in-kernel counter-based noise ----
    row = (lax.broadcasted_iota(jnp.int32, z.shape, 0)
           + pl.program_id(0) * tb)                             # global row id
    col = lax.broadcasted_iota(jnp.int32, z.shape, 1)
    g = _gumbel_noise(row, col, ap, seed_ref[0].astype(jnp.uint32))

    # Mask padded action lanes so they can never win the argmax.
    noisy = jnp.where(col < action_size, z + g, -jnp.inf)
    m = jnp.max(noisy, axis=-1, keepdims=True)
    idx = jnp.min(jnp.where(noisy >= m, col, ap), axis=-1, keepdims=True)
    act_ref[...] = idx                                          # (TB, 1) int32


def prepare_params(w1, b1, w2, b2):
    """Pad the action dim to a lane-dense width and cast weights to bf16.

    Call ONCE at init / after each parameter update (not per forward step) so
    the per-step pallas_call sees ready-to-DMA tensors.
    """
    S, H = w1.shape
    A = w2.shape[1]
    AP = _round_up(max(A, LANE), LANE)
    return dict(
        w1=w1.astype(jnp.bfloat16),
        b1=b1.reshape(1, H).astype(jnp.float32),
        w2=jnp.pad(w2, ((0, 0), (0, AP - A))).astype(jnp.bfloat16),
        b2=jnp.pad(b2.reshape(1, A), ((0, 0), (0, AP - A))).astype(jnp.float32),
        state_size=S, hidden=H, action_size=A, padded_actions=AP,
    )


def policy_forward(state, params, seed, *, block_b=512, return_logits=False):
    """Policy.forward: returns sampled actions [B] int32.

    With return_logits=True also returns the PADDED lane-dense logits
    (B_pad, AP) f32 — callers slice [:B, :A] only if they actually need it.
    """
    B, S = state.shape
    H = params["hidden"]
    A = params["action_size"]
    AP = params["padded_actions"]
    assert S == params["state_size"]

    # Batch tiling: bound padding (<= one extra 16-row sublane group per tile)
    # and split into >= 2 tiles when possible so v7x's second TC gets work.
    B_al = _round_up(B, SUBLANE)
    nb = max(1, -(-B_al // block_b))
    if nb == 1 and B_al >= 2 * SUBLANE:
        nb = 2
    TB = _round_up(-(-B_al // nb), SUBLANE)
    nb = -(-B_al // TB)
    B_pad = TB * nb

    state_b = jnp.pad(state, ((0, B_pad - B), (0, 0))).astype(jnp.bfloat16)
    seed_arr = jnp.asarray([seed], dtype=jnp.int32)

    out_shape = [jax.ShapeDtypeStruct((B_pad, 1), jnp.int32)]
    out_specs = [pl.BlockSpec((TB, 1), lambda i, seed: (i, 0))]
    if return_logits:
        out_shape.append(jax.ShapeDtypeStruct((B_pad, AP), jnp.float32))
        out_specs.append(pl.BlockSpec((TB, AP), lambda i, seed: (i, 0)))

    grid_spec = pltpu.PrefetchScalarGridSpec(
        num_scalar_prefetch=1,
        grid=(nb,),
        in_specs=[
            pl.BlockSpec((TB, S), lambda i, seed: (i, 0)),   # state tile (streamed)
            pl.BlockSpec((S, H), lambda i, seed: (0, 0)),    # w1 (resident)
            pl.BlockSpec((1, H), lambda i, seed: (0, 0)),    # b1 (resident)
            pl.BlockSpec((H, AP), lambda i, seed: (0, 0)),   # w2 padded (resident)
            pl.BlockSpec((1, AP), lambda i, seed: (0, 0)),   # b2 padded (resident)
        ],
        out_specs=tuple(out_specs),
    )

    bytes_accessed = (2 * (B_pad * S + S * H + H * AP) + 4 * (H + AP)
                      + 4 * B_pad + (4 * B_pad * AP if return_logits else 0))
    cost = pl.CostEstimate(
        flops=2 * B_pad * S * H + 2 * B_pad * H * AP,
        transcendentals=2 * B_pad * AP,
        bytes_accessed=bytes_accessed,
    )

    outs = pl.pallas_call(
        functools.partial(_policy_kernel, A),
        out_shape=tuple(out_shape),
        grid_spec=grid_spec,
        compiler_params=pltpu.CompilerParams(
            # NOTE: VMEM use is tiny (< 2 MiB even at TB=1024); set
            # vmem_limit_bytes explicitly only if block_b grows past ~2048 or
            # a value head is fused in (v5e scoped default is 16 MiB).
            dimension_semantics=("parallel",),
        ),
        cost_estimate=cost,
    )(seed_arr, state_b, params["w1"], params["b1"], params["w2"], params["b2"])

    actions = outs[0][:B, 0]
    if return_logits:
        return actions, outs[1]
    return actions


if __name__ == "__main__":
    # Small, bsuite-like shapes.
    B = 8            # batch of states
    STATE_SIZE = 16  # env.state_size
    HIDDEN = 128
    ACTION_SIZE = 8  # env.action_size

    key = jax.random.PRNGKey(0)
    kx, kw1, kb1, kw2, kb2 = jax.random.split(key, 5)

    # Deterministic parameter init (nn.Linear-style uniform bounds).
    bound1 = 1.0 / (STATE_SIZE ** 0.5)
    w1 = jax.random.uniform(kw1, (STATE_SIZE, HIDDEN), jnp.float32, -bound1, bound1)
    b1 = jax.random.uniform(kb1, (HIDDEN,), jnp.float32, -bound1, bound1)
    bound2 = 1.0 / (HIDDEN ** 0.5)
    w2 = jax.random.uniform(kw2, (HIDDEN, ACTION_SIZE), jnp.float32, -bound2, bound2)
    b2 = jax.random.uniform(kb2, (ACTION_SIZE,), jnp.float32, -bound2, bound2)

    state = jax.random.normal(kx, (B, STATE_SIZE), jnp.float32)

    params = prepare_params(w1, b1, w2, b2)   # padded / cast once, not per step
    seed = 1234

    # Primary path — matches Policy.forward (density.sample().detach()).
    actions = policy_forward(state, params, seed)
    jax.block_until_ready(actions)

    # Verification path — also emit the (padded) logits once.
    actions2, logits_padded = policy_forward(state, params, seed, return_logits=True)
    jax.block_until_ready((actions2, logits_padded))

    # Reference MLP with the same bf16 casting as the kernel.
    xb = state.astype(jnp.bfloat16)
    h_ref = jnp.maximum(
        jnp.dot(xb, params["w1"], preferred_element_type=jnp.float32) + params["b1"],
        0.0)
    z_ref = jnp.dot(h_ref.astype(jnp.bfloat16), params["w2"],
                    preferred_element_type=jnp.float32) + params["b2"]
    assert logits_padded.shape[1] == params["padded_actions"]
    assert jnp.allclose(logits_padded[:B], z_ref[:B], atol=1e-3, rtol=1e-3)

    # Reference Gumbel-max sample using the same counter-based noise.
    AP = params["padded_actions"]
    row = jnp.arange(B, dtype=jnp.int32)[:, None]
    col = jnp.arange(AP, dtype=jnp.int32)[None, :]
    g_ref = _gumbel_noise(row, col, AP, jnp.uint32(seed))
    noisy_ref = jnp.where(col < ACTION_SIZE, logits_padded[:B] + g_ref, -jnp.inf)

    assert actions.shape == (B,) and actions.dtype == jnp.int32
    assert bool(jnp.all((actions >= 0) & (actions < ACTION_SIZE)))
    assert jnp.array_equal(actions, actions2)                      # path-independent
    assert jnp.array_equal(actions, policy_forward(state, params, seed))  # deterministic
    picked = noisy_ref[jnp.arange(B), actions]
    assert bool(jnp.all(picked >= noisy_ref.max(axis=-1) - 1e-3))  # attains row max

    print("KERNEL_OK")
</pallas_src>

<mosaic_0001>
module attributes {stable_mosaic.version = 11 : i64} {
  func.func @_policy_kernel(%arg0: i32, %arg1: memref<1xi32, #tpu.memory_space<smem>>, %arg2: memref<16x16xbf16, #tpu.memory_space<vmem>>, %arg3: memref<16x128xbf16, #tpu.memory_space<vmem>>, %arg4: memref<1x128xf32, #tpu.memory_space<vmem>>, %arg5: memref<128x128xbf16, #tpu.memory_space<vmem>>, %arg6: memref<1x128xf32, #tpu.memory_space<vmem>>, %arg7: memref<16x1xi32, #tpu.memory_space<vmem>>) attributes {dimension_semantics = [#tpu.dimension_semantics<parallel>], iteration_bounds = array<i64: 1>, scalar_prefetch = 1 : i64, scratch_operands = 0 : i64, tpu.core_type = #tpu.core_type<tc>, window_params = [{transform_indices = @transform_0, window_bounds = array<i64: 16, 16>}, {pipeline_mode = #tpu.pipeline_mode<synchronous>, transform_indices = @transform_1, window_bounds = array<i64: 16, 128>}, {pipeline_mode = #tpu.pipeline_mode<synchronous>, transform_indices = @transform_2, window_bounds = array<i64: 1, 128>}, {pipeline_mode = #tpu.pipeline_mode<synchronous>, transform_indices = @transform_3, window_bounds = array<i64: 128, 128>}, {pipeline_mode = #tpu.pipeline_mode<synchronous>, transform_indices = @transform_4, window_bounds = array<i64: 1, 128>}, {transform_indices = @transform_5, window_bounds = array<i64: 16, 1>}]} {
    %c0 = arith.constant 0 : index
    %c0_0 = arith.constant 0 : index
    %0 = vector.load %arg2[%c0, %c0_0] : memref<16x16xbf16, #tpu.memory_space<vmem>>, vector<16x16xbf16>
    %c0_1 = arith.constant 0 : index
    %c0_2 = arith.constant 0 : index
    %1 = vector.load %arg3[%c0_1, %c0_2] : memref<16x128xbf16, #tpu.memory_space<vmem>>, vector<16x128xbf16>
    %cst = arith.constant dense<0.000000e+00> : vector<16x128xf32>
    %2 = tpu.matmul %0, %1, %cst {dimension_numbers = #tpu.dot_dimension_numbers<[1], [0], [0], [1], [0, 0, 1, 1], [], []>} : vector<16x16xbf16>, vector<16x128xbf16>, vector<16x128xf32> -> vector<16x128xf32>
    %c0_3 = arith.constant 0 : index
    %c0_4 = arith.constant 0 : index
    %3 = vector.load %arg4[%c0_3, %c0_4] : memref<1x128xf32, #tpu.memory_space<vmem>>, vector<1x128xf32>
    %4 = vector.broadcast %3 : vector<1x128xf32> to vector<16x128xf32>
    %5 = arith.addf %2, %4 : vector<16x128xf32>
    %cst_5 = arith.constant 0.000000e+00 : f32
    %6 = vector.broadcast %cst_5 : f32 to vector<16x128xf32>
    %7 = arith.maximumf %5, %6 : vector<16x128xf32>
    %8 = arith.truncf %7 : vector<16x128xf32> to vector<16x128xbf16>
    %c0_6 = arith.constant 0 : index
    %c0_7 = arith.constant 0 : index
    %9 = vector.load %arg5[%c0_6, %c0_7] : memref<128x128xbf16, #tpu.memory_space<vmem>>, vector<128x128xbf16>
    %cst_8 = arith.constant dense<0.000000e+00> : vector<16x128xf32>
    %10 = tpu.matmul %8, %9, %cst_8 {dimension_numbers = #tpu.dot_dimension_numbers<[1], [0], [0], [1], [0, 0, 1, 1], [], []>} : vector<16x128xbf16>, vector<128x128xbf16>, vector<16x128xf32> -> vector<16x128xf32>
    %c0_9 = arith.constant 0 : index
    %c0_10 = arith.constant 0 : index
    %11 = vector.load %arg6[%c0_9, %c0_10] : memref<1x128xf32, #tpu.memory_space<vmem>>, vector<1x128xf32>
    %12 = vector.broadcast %11 : vector<1x128xf32> to vector<16x128xf32>
    %13 = arith.addf %10, %12 : vector<16x128xf32>
    %14 = tpu.iota {dimensions = array<i32: 0>} : vector<16x128xi32>
    %c16_i32 = arith.constant 16 : i32
    %15 = arith.muli %arg0, %c16_i32 : i32
    %16 = vector.broadcast %15 : i32 to vector<16x128xi32>
    %17 = arith.addi %14, %16 : vector<16x128xi32>
    %18 = tpu.iota {dimensions = array<i32: 1>} : vector<16x128xi32>
    %c0_11 = arith.constant 0 : index
    %19 = memref.load %arg1[%c0_11] : memref<1xi32, #tpu.memory_space<smem>>
    %c128_i32 = arith.constant 128 : i32
    %20 = vector.broadcast %c128_i32 : i32 to vector<16x128xi32>
    %21 = arith.muli %17, %20 : vector<16x128xi32>
    %22 = arith.addi %21, %18 : vector<16x128xi32>
    %c-1640531535_i32 = arith.constant -1640531535 : i32
    %23 = arith.muli %19, %c-1640531535_i32 : i32
    %24 = vector.broadcast %23 : i32 to vector<16x128xi32>
    %25 = arith.addi %22, %24 : vector<16x128xi32>
    %c16_i32_12 = arith.constant 16 : i32
    %26 = vector.broadcast %c16_i32_12 : i32 to vector<16x128xi32>
    %27 = arith.shrui %25, %26 : vector<16x128xi32>
    %28 = arith.xori %25, %27 : vector<16x128xi32>
    %c-2048144789_i32 = arith.constant -2048144789 : i32
    %29 = vector.broadcast %c-2048144789_i32 : i32 to vector<16x128xi32>
    %30 = arith.muli %28, %29 : vector<16x128xi32>
    %c13_i32 = arith.constant 13 : i32
    %31 = vector.broadcast %c13_i32 : i32 to vector<16x128xi32>
    %32 = arith.shrui %30, %31 : vector<16x128xi32>
    %33 = arith.xori %30, %32 : vector<16x128xi32>
    %c-1028477387_i32 = arith.constant -1028477387 : i32
    %34 = vector.broadcast %c-1028477387_i32 : i32 to vector<16x128xi32>
    %35 = arith.muli %33, %34 : vector<16x128xi32>
    %c16_i32_13 = arith.constant 16 : i32
    %36 = vector.broadcast %c16_i32_13 : i32 to vector<16x128xi32>
    %37 = arith.shrui %35, %36 : vector<16x128xi32>
    %38 = arith.xori %35, %37 : vector<16x128xi32>
    %c8_i32 = arith.constant 8 : i32
    %39 = vector.broadcast %c8_i32 : i32 to vector<16x128xi32>
    %40 = arith.shrui %38, %39 : vector<16x128xi32>
    %c1_i32 = arith.constant 1 : i32
    %41 = vector.broadcast %c1_i32 : i32 to vector<16x128xi32>
    %42 = arith.ori %40, %41 : vector<16x128xi32>
    %43 = arith.sitofp %42 : vector<16x128xi32> to vector<16x128xf32>
    %cst_14 = arith.constant 5.96046448E-8 : f32
    %44 = vector.broadcast %cst_14 : f32 to vector<16x128xf32>
    %45 = arith.mulf %43, %44 : vector<16x128xf32>
    %46 = math.log %45 : vector<16x128xf32>
    %cst_15 = arith.constant 0.000000e+00 : f32
    %47 = vector.broadcast %cst_15 : f32 to vector<16x128xf32>
    %48 = arith.subf %47, %46 : vector<16x128xf32>
    %49 = math.log %48 : vector<16x128xf32>
    %cst_16 = arith.constant 0.000000e+00 : f32
    %50 = vector.broadcast %cst_16 : f32 to vector<16x128xf32>
    %51 = arith.subf %50, %49 : vector<16x128xf32>
    %c8_i32_17 = arith.constant 8 : i32
    %52 = vector.broadcast %c8_i32_17 : i32 to vector<16x128xi32>
    %53 = arith.cmpi slt, %18, %52 : vector<16x128xi32>
    %54 = arith.addf %13, %51 : vector<16x128xf32>
    %cst_18 = arith.constant 0xFF800000 : f32
    %55 = vector.broadcast %cst_18 : f32 to vector<16x128xf32>
    %56 = arith.select %53, %54, %55 : vector<16x128xi1>, vector<16x128xf32>
    %cst_19 = arith.constant dense<0xFF800000> : vector<16xf32>
    %57 = vector.multi_reduction <maximumf>, %56, %cst_19 [1] : vector<16x128xf32> to vector<16xf32>
    %58 = vector.shape_cast %57 : vector<16xf32> to vector<16x1xf32>
    %59 = vector.broadcast %58 : vector<16x1xf32> to vector<16x128xf32>
    %60 = arith.cmpf oge, %56, %59 : vector<16x128xf32>
    %c128_i32_20 = arith.constant 128 : i32
    %61 = vector.broadcast %c128_i32_20 : i32 to vector<16x128xi32>
    %62 = arith.select %60, %18, %61 : vector<16x128xi1>, vector<16x128xi32>
    %cst_21 = arith.constant dense<2147483647> : vector<16xi32>
    %63 = vector.multi_reduction <minsi>, %62, %cst_21 [1] : vector<16x128xi32> to vector<16xi32>
    %64 = vector.shape_cast %63 : vector<16xi32> to vector<16x1xi32>
    %c0_22 = arith.constant 0 : index
    %c0_23 = arith.constant 0 : index
    %65 = vector.load %arg7[%c0_22, %c0_23] : memref<16x1xi32, #tpu.memory_space<vmem>>, vector<16x1xi32>
    tpu.vector_store %arg7[%c0_22, %c0_23], %64 {strides = array<i32>} : memref<16x1xi32, #tpu.memory_space<vmem>>, vector<16x1xi32>,
    return
  }
  func.func @transform_0(%arg0: i32, %arg1: memref<1xi32, #tpu.memory_space<smem>>) -> (i32, i32) {
    %c0_i32 = arith.constant 0 : i32
    %c0_i32_0 = arith.constant 0 : i32
    return %arg0, %c0_i32 : i32, i32
  }
  func.func @transform_1(%arg0: i32, %arg1: memref<1xi32, #tpu.memory_space<smem>>) -> (i32, i32) {
    %c0_i32 = arith.constant 0 : i32
    %c0_i32_0 = arith.constant 0 : i32
    %c0_i32_1 = arith.constant 0 : i32
    return %c0_i32, %c0_i32_0 : i32, i32
  }
  func.func @transform_2(%arg0: i32, %arg1: memref<1xi32, #tpu.memory_space<smem>>) -> (i32, i32) {
    %c0_i32 = arith.constant 0 : i32
    %c0_i32_0 = arith.constant 0 : i32
    %c0_i32_1 = arith.constant 0 : i32
    return %c0_i32, %c0_i32_0 : i32, i32
  }
  func.func @transform_3(%arg0: i32, %arg1: memref<1xi32, #tpu.memory_space<smem>>) -> (i32, i32) {
    %c0_i32 = arith.constant 0 : i32
    %c0_i32_0 = arith.constant 0 : i32
    %c0_i32_1 = arith.constant 0 : i32
    return %c0_i32, %c0_i32_0 : i32, i32
  }
  func.func @transform_4(%arg0: i32, %arg1: memref<1xi32, #tpu.memory_space<smem>>) -> (i32, i32) {
    %c0_i32 = arith.constant 0 : i32
    %c0_i32_0 = arith.constant 0 : i32
    %c0_i32_1 = arith.constant 0 : i32
    return %c0_i32, %c0_i32_0 : i32, i32
  }
  func.func @transform_5(%arg0: i32, %arg1: memref<1xi32, #tpu.memory_space<smem>>) -> (i32, i32) {
    %c0_i32 = arith.constant 0 : i32
    %c0_i32_0 = arith.constant 0 : i32
    return %arg0, %c0_i32 : i32, i32
  }
}

</mosaic_0001>

<bundles_post_ra>
// kernel: tpu_custom_call.1
= control target key start
LH: loop header
LB: loop body
LE: loop exit
PB: predicated region body
PF: predicated region fallthrough
CT: control target
= control target key end

     0   :  { %12 = vsyncpa [#allocation5], 0  ;;  %s611_s0 = inlined_call_operand.<no memory space> [shape: s32[1], index: 0, kind: input, shape index: {}]   ;;  %s612_s1 = inlined_call_operand.hbm [shape: bf16[16,16], index: 1, kind: input, shape index: {}]   ;;  %s613_s2 = inlined_call_operand.hbm [shape: bf16[16,128], index: 2, kind: input, shape index: {}]   ;;  %s614_s3 = inlined_call_operand.vmem [shape: f32[1,128], index: 3, kind: input, shape index: {}]   ;;  %s615_s4 = inlined_call_operand.hbm [shape: bf16[128,128], index: 4, kind: input, shape index: {}]   ;;  %s616_s5 = inlined_call_operand.vmem [shape: f32[1,128], index: 5, kind: input, shape index: {}]   ;;  %s617_s6 = inlined_call_operand.vmem [shape: s32[16,1], index: 6, kind: output, shape index: {}]  }
   0x1   :  { %13 = vsyncpa [#allocation7], 0  ;;  %s495_s21 = smov [#allocation6]   ;;  %s496_s23 = smov [#allocation4]  }
   0x2   :  { %s31_s22 = sshll.u32 %s495_s21, 4  ;;  %s19_s24 = sshll.u32 %s496_s23, 4  ;;  %s32_s22 = int_to_ptr.vmem [resolvable:$true] %s31_s22  ;;  %s537_s24 = int_to_ptr.vmem [resolvable:$true] %s19_s24 }
   0x3   :  { %s425_s27 = scalar_lea.hbm %s613_s2, 128 }
   0x4   :  { %p426_p0 = scmp.ne.s32.totalorder %s613_s2, %s425_s27  ;;  %p429_p1 = scmp.lt.u32.totalorder %s425_s27, %s613_s2 }
   0x6   :  { %p431_p2 = pnand %p429_p1, %p426_p0 }
   0x8   :  { %434 = shalt.err (!%p431_p2)
}
   0x9   :  { %s435_s8 = scalar_lea.vmem %s32_s22, 128  ;;  %p440_p4 = scmp.lt.s32.totalorder %s32_s22, %s32_s22 }
   0xa   :  { %p436_p3 = scmp.ne.s32.totalorder %s32_s22, %s435_s8  ;;  %p441_p5 = scmp.lt.s32.totalorder %s435_s8, %s435_s8 }
   0xc   :  { %p442_p6 = por %p441_p5, %p440_p4 }
   0xe   :  { %p443_p7 = pnand %p442_p6, %p436_p3 }
  0x10   :  { %446 = shalt.err (!%p443_p7)
}
  0x11   :  { %s497_s9 = smov 64   ;;  %s498_s10 = smov 4  }
  0x12   :  { %37 = dma.hbm_to_vmem [thread:$0]  %s613_s2, 128, %s32_s22, [#allocation7], %s497_s9, %s497_s9, %s498_s10  }
  0x13   :  { %s447_s15 = scalar_lea.hbm %s612_s1, 128 }
  0x14   :  { %p448_p8 = scmp.ne.s32.totalorder %s612_s1, %s447_s15  ;;  %p451_p9 = scmp.lt.u32.totalorder %s447_s15, %s612_s1 }
  0x16   :  { %p453_p10 = pnand %p451_p9, %p448_p8 }
  0x18   :  { %456 = shalt.err (!%p453_p10)
}
  0x19   :  { %s457_s20 = scalar_lea.vmem %s537_s24, 128  ;;  %p462_p12 = scmp.lt.s32.totalorder %s537_s24, %s537_s24 }
  0x1a   :  { %p458_p11 = scmp.ne.s32.totalorder %s537_s24, %s457_s20  ;;  %p463_p13 = scmp.lt.s32.totalorder %s457_s20, %s457_s20 }
  0x1c   :  { %p464_p0 = por %p463_p13, %p462_p12 }
  0x1e   :  { %p465_p1 = pnand %p464_p0, %p458_p11 }
  0x20   :  { %468 = shalt.err (!%p465_p1)
}
  0x21   :  { %25 = dma.hbm_to_vmem [thread:$0]  %s612_s1, 128, %s537_s24, [#allocation5], %s497_s9, %s497_s9, %s498_s10  }
  0x22   :  { %s499_s22 = smov [#allocation8]   ;;  %s469_s27 = scalar_lea.hbm %s615_s4, 1024 }
  0x23   :  { %s45_s23 = sshll.u32 %s499_s22, 4  ;;  %p470_p2 = scmp.ne.s32.totalorder %s615_s4, %s469_s27  ;;  %s46_s23 = int_to_ptr.vmem [resolvable:$true] %s45_s23 }
  0x24   :  { %p473_p3 = scmp.lt.u32.totalorder %s469_s27, %s615_s4 }
  0x26   :  { %p475_p4 = pnand %p473_p3, %p470_p2 }
  0x28   :  { %478 = shalt.err (!%p475_p4)
}
  0x29   :  { %s479_s8 = scalar_lea.vmem %s46_s23, 1024  ;;  %p484_p6 = scmp.lt.s32.totalorder %s46_s23, %s46_s23 }
  0x2a   :  { %p480_p5 = scmp.ne.s32.totalorder %s46_s23, %s479_s8  ;;  %p485_p7 = scmp.lt.s32.totalorder %s479_s8, %s479_s8 }
  0x2c   :  { %p486_p8 = por %p485_p7, %p484_p6 }
  0x2e   :  { %p487_p9 = pnand %p486_p8, %p480_p5 }
  0x30   :  { %490 = shalt.err (!%p487_p9)
}
  0x31   :  { %51 = dma.hbm_to_vmem [thread:$0]  %s615_s4, 1024, %s46_s23, [#allocation7], %s497_s9, %s497_s9, %s498_s10  }
  0x32   :  { %491 = dma.done.wait [#allocation5], 128  }
  0x33   :  { %492 = vsyncadd [#allocation5], 4294967168 }
  0x34   :  { %493 = dma.done.wait [#allocation7], 1152  }
  0x35   :  { %494 = vsyncadd [#allocation7], 4294966144  ;;  %v500_v0 = vmov 0.0   ;;  %vm501_vm0 = vmmov 0   ;;  %v407_v1 = vld [vmem:[#allocation6] sm:$0xff]   ;;  %v408_v2 = vld [vmem:[#allocation4] sm:$0xff]   ;;  %v246_v21 = vlaneseq }
  0x36   :  { %374 = vmatprep.subr.bf16.mxu0 %v500_v0  ;;  %376 = vmatprep.mubr.msk.bf16.mxu0 %vm501_vm0, %v500_v0  ;;  %vm86_vm1 = vcmask 130048   ;;  %v409_v3 = vld [vmem:[#allocation8] sm:$0xff]   ;;  %v410_v4 = vld [vmem:[#allocation8 + $0x8] sm:$0xff]   ;;  %v411_v5 = vld [vmem:[#allocation8 + $0x10] sm:$0xff]   ;;  %vm341_vm7 = vcmask 7168  }
  0x37   :  { %380 = vmatprep.subr.bf16.mxu1 %v500_v0  ;;  %396 = vmatprep.mubr.msk.bf16.mxu1 %vm501_vm0, %v500_v0  ;;  %v412_v6 = vld [vmem:[#allocation8 + $0x18] sm:$0xff]   ;;  %v413_v7 = vld [vmem:[#allocation8 + $0x20] sm:$0xff]   ;;  %v414_v8 = vld [vmem:[#allocation8 + $0x28] sm:$0xff]   ;;  %v247_v22 = vshrl.u32 %v246_v21, 7  ;;  %v592_v24 = vand.u32 127, %v246_v21 }
  0x38   :  { %375 = vmatpush3.bf16.msra.mxu0 %v407_v1  ;;  %381 = vmatpush3.bf16.msra.mxu1 %v409_v3  ;;  %v415_v9 = vld [vmem:[#allocation8 + $0x30] sm:$0xff]   ;;  %v416_v10 = vld [vmem:[#allocation8 + $0x38] sm:$0xff]  }
  0x39   :  { %382 = vmatprep.subr.bf16.mxu1 %v500_v0  ;;  %v350_v11 = vld [vmem:[%s614_s3] ss:$0 sm:$0xff]  ;;  %v248_v23 = vadd.s32 8, %v247_v22  ;;  %v256_v25 = vmul.u32 128, %v247_v22  ;;  %s260_s3 = smul.u32 2654435761, %s611_s0 }
  0x3a   :  { %vm300_vm2 = vcmp.lt.s32.totalorder %v592_v24, 8 }
  0x3b   :  { %377 = vmatmul.mubr.msk.bf16.vlgmr.msra.gmra.mrb[0].mxu0 %vm86_vm1, %v408_v2  ;;  %v257_v26 = vmul.u32 128, %v248_v23  ;;  %v258_v27 = vadd.s32 %v256_v25, %v592_v24  ;;  %v261_v28 = vstv %s260_s3  ;;  %v354_v2 = vld [vmem:[%s616_s5] ss:$0 sm:$0xff] }
  0x3c   :  { %383 = vmatpush3.bf16.msra.mxu1 %v410_v4 }
  0x3d   :  { %384 = vmatprep.subr.bf16.mxu1 %v500_v0  ;;  %v259_v29 = vadd.s32 %v257_v26, %v592_v24  ;;  %v262_v30 = vadd.s32 %v261_v28, %v258_v27 }
  0x3f   :  { %v263_v31 = vadd.s32 %v261_v28, %v259_v29  ;;  %v264_v32 = vshrl.u32 %v262_v30, 16 }
  0x40   :  { %385 = vmatpush3.bf16.msra.mxu1 %v411_v5 }
  0x41   :  { %386 = vmatprep.subr.bf16.mxu1 %v500_v0  ;;  %v265_v33 = vshrl.u32 %v263_v31, 16  ;;  %v266_v34 = vxor.u32 %v264_v32, %v262_v30 }
  0x43   :  { %v267_v35 = vxor.u32 %v265_v33, %v263_v31  ;;  %v268_v36 = vmul.u32 2246822507, %v266_v34 }
  0x44   :  { %387 = vmatpush3.bf16.msra.mxu1 %v412_v6 }
  0x45   :  { %388 = vmatprep.subr.bf16.mxu1 %v500_v0  ;;  %v269_v37 = vmul.u32 2246822507, %v267_v35  ;;  %v270_v38 = vshrl.u32 %v268_v36, 13 }
  0x47   :  { %v271_v39 = vshrl.u32 %v269_v37, 13  ;;  %v272_v40 = vxor.u32 %v270_v38, %v268_v36 }
  0x48   :  { %389 = vmatpush3.bf16.msra.mxu1 %v413_v7 }
  0x49   :  { %390 = vmatprep.subr.bf16.mxu1 %v500_v0  ;;  %v273_v41 = vxor.u32 %v271_v39, %v269_v37  ;;  %v274_v42 = vmul.u32 3266489909, %v272_v40 }
  0x4b   :  { %v275_v43 = vmul.u32 3266489909, %v273_v41  ;;  %v276_v44 = vshrl.u32 %v274_v42, 16 }
  0x4c   :  { %391 = vmatpush3.bf16.msra.mxu1 %v414_v8 }
  0x4d   :  { %392 = vmatprep.subr.bf16.mxu1 %v500_v0  ;;  %v277_v45 = vshrl.u32 %v275_v43, 16  ;;  %v278_v46 = vxor.u32 %v276_v44, %v274_v42 }
  0x4f   :  { %v279_v47 = vxor.u32 %v277_v45, %v275_v43  ;;  %v280_v48 = vshrl.u32 %v278_v46, 8 }
  0x50   :  { %393 = vmatpush3.bf16.msra.mxu1 %v415_v9 }
  0x51   :  { %394 = vmatprep.subr.bf16.mxu1 %v500_v0  ;;  %v281_v49 = vshrl.u32 %v279_v47, 8  ;;  %v282_v50 = vor.u32 1, %v280_v48 }
  0x53   :  { %v283_v51 = vor.u32 1, %v281_v49  ;;  %v284_v52 = vcvt.s32.f32 %v282_v50 }
  0x54   :  { %395 = vmatpush3.bf16.msra.mxu1 %v416_v10 }
  0x55   :  { %v285_v53 = vcvt.s32.f32 %v283_v51  ;;  %v286_v54 = vmul.f32 5.9604645e-08, %v284_v52 }
  0x57   :  { %v287_v55 = vmul.f32 5.9604645e-08, %v285_v53  ;;  %417 = vlog2.f32 %v286_v54 }
  0x59   :  { %419 = vlog2.f32 %v287_v55 }
  0x61   :  { %v418_v56 = vpop.eup %417 }
  0x62   :  { %v289_v58 = vmul.f32 0.6931472, %v418_v56 }
  0x63   :  { %v420_v57 = vpop.eup %419 }
  0x64   :  { %v291_v59 = vmul.f32 0.6931472, %v420_v57  ;;  %v292_v60 = vsub.f32 0.0, %v289_v58 }
  0x66   :  { %v293_v61 = vsub.f32 0.0, %v291_v59  ;;  %421 = vlog2.f32 %v292_v60 }
  0x68   :  { %423 = vlog2.f32 %v293_v61 }
  0x70   :  { %v422_v62 = vpop.eup %421 }
  0x71   :  { %v295_v0 = vmul.f32 0.6931472, %v422_v62 }
  0x72   :  { %v424_v63 = vpop.eup %423 }
  0x73   :  { %v297_v1 = vmul.f32 0.6931472, %v424_v63  ;;  %v298_v3 = vsub.f32 0.0, %v295_v0 }
  0x75   :  { %v299_v7 = vsub.f32 0.0, %v297_v1 }
 0x10e   :  { %v124_v12 = vpop.f32.mrb[0].mxu0 }
 0x10f   :  { %v125_v13 = vadd.f32 %v350_v11, %v124_v12  ;;  %v378_v14 = vpop.f32.mrb[1].mxu0 }
 0x110   :  { %v127_v15 = vpop.f32.mrb[2].mxu0 }
 0x111   :  { %v128_v16 = vadd.f32 %v350_v11, %v127_v15  ;;  %v379_v17 = vpop.f32.mrb[3].mxu0  ;;  %v131_v18 = vmax.f32 %v125_v13, 0.0 }
 0x113   :  { %v132_v19 = vmax.f32 %v128_v16, 0.0 }
 0x115   :  { %v133_v20 = vpack.c.bf16 %v132_v19, %v131_v18 }
 0x117   :  { %397 = vmatmul.mubr.bf16.vlgmr.msra.gmra.mrb[0].mxu1 %v133_v20 }
 0x1ea   :  { %v239_v4 = vpop.f32.mrb[0].mxu1 }
 0x1eb   :  { %v240_v5 = vadd.f32 %v354_v2, %v239_v4  ;;  %v398_v6 = vpop.f32.mrb[1].mxu1 }
 0x1ec   :  { %v242_v8 = vpop.f32.mrb[2].mxu1 }
 0x1ed   :  { %v243_v9 = vadd.f32 %v354_v2, %v242_v8  ;;  %v399_v10 = vpop.f32.mrb[3].mxu1  ;;  %v301_v11 = vadd.f32 %v298_v3, %v240_v5 }
 0x1ef   :  { %v303_v12 = vsel %vm300_vm2, %v301_v11, -inf  ;;  %v302_v13 = vadd.f32 %v299_v7, %v243_v9 }
 0x1f0   :  { %305 = vmax.xlane.f32.xlu0 %v303_v12 }
 0x1f1   :  { %v304_v14 = vsel %vm300_vm2, %v302_v13, -inf }
 0x1f4   :  { %307 = vmax.xlane.f32.xlu0 %v304_v14 }
 0x27d   :  { %v306_v15 = vpop.xlane.xlu0 %305 }
 0x27e   :  { %vm309_vm3 = vcmp.ge.f32.partialorder %v303_v12, %v306_v15 }
 0x27f   :  { %v311_v16 = vsel %vm309_vm3, %v592_v24, 128 }
 0x280   :  { %v314_v17 = vshra.s32 %v311_v16, 16  ;;  %v313_v23 = vand.u32 65535, %v311_v16 }
 0x281   :  { %v308_v18 = vpop.xlane.xlu0 %307 }
 0x282   :  { %vm310_vm4 = vcmp.ge.f32.partialorder %v304_v14, %v308_v18  ;;  %v316_v19 = vcvt.s32.f32 %v314_v17  ;;  %v315_v27 = vcvt.s32.f32 %v313_v23 }
 0x283   :  { %v312_v20 = vsel %vm310_vm4, %v592_v24, 128 }
 0x284   :  { %317 = vmin.xlane.f32.xlu1 %v316_v19  ;;  %v328_v21 = vshra.s32 %v312_v20, 16  ;;  %v327_v25 = vand.u32 65535, %v312_v20 }
 0x286   :  { %v330_v22 = vcvt.s32.f32 %v328_v21  ;;  %v329_v30 = vcvt.s32.f32 %v327_v25 }
 0x288   :  { %331 = vmin.xlane.f32.xlu1 %v330_v22 }
 0x311   :  { %v318_v26 = vpop.xlane.xlu1 %317 }
 0x312   :  { %vm319_vm5 = vcmp.eq.f32.partialorder %v316_v19, %v318_v26  ;;  %v324_v32 = vcvt.f32.s32 %v318_v26 }
 0x313   :  { %v320_v28 = vsel %vm319_vm5, %v315_v27, inf }
 0x314   :  { %321 = vmin.xlane.f32.xlu0 %v320_v28  ;;  %v325_v34 = vshll.u32 %v324_v32, 16 }
 0x315   :  { %v332_v29 = vpop.xlane.xlu1 %331 }
 0x316   :  { %vm333_vm6 = vcmp.eq.f32.partialorder %v330_v22, %v332_v29  ;;  %v338_v24 = vcvt.f32.s32 %v332_v29 }
 0x317   :  { %v334_v31 = vsel %vm333_vm6, %v329_v30, inf }
 0x318   :  { %335 = vmin.xlane.f32.xlu1 %v334_v31  ;;  %v339_v38 = vshll.u32 %v338_v24, 16 }
 0x3a1   :  { %v322_v33 = vpop.xlane.xlu0 %321 }
 0x3a2   :  { %v323_v35 = vcvt.f32.s32 %v322_v33 }
 0x3a4   :  { %v326_v36 = vadd.s32 %v325_v34, %v323_v35 }
 0x3a5   :  { %v336_v37 = vpop.xlane.xlu1 %335 }
 0x3a6   :  { %342 = vst.msk [vmem:[%s617_s6] sm:$0xff] %vm341_vm7, %v326_v36  ;;  %v337_v39 = vcvt.f32.s32 %v336_v37 }
 0x3a8   :  { %v340_v40 = vadd.s32 %v339_v38, %v337_v39 }
 0x3aa   :  { %343 = vst.msk [vmem:[%s617_s6 + $0x8] sm:$0xff] %vm341_vm7, %v340_v40 }
 0x3ab   :  { %348 = vsyncpa [#allocation5], 1 }
 0x3ac   :  { %349 = vsyncpa [#allocation7], 1 }

</bundles_post_ra>
